<compile_context>
chip_gen: v6e
topology: v6e:2x2x1
jax: 0.10.0
libtpu: 0.0.40
codegen_flags: <defaults>
</compile_context>

<pallas_src>
import jax
import jax.numpy as jnp
from jax import lax
from jax.experimental import pallas as pl
from jax.experimental.pallas import tpu as pltpu

SUBLANE = 8
ROW_ALIGN = 16                    # multiple of 8 (f32) and 16 (bf16 packing)
TARGET_BLOCK_BYTES = 2 << 20      # ~2 MiB per streamed input per grid step


def _cdiv(a, b):
    return -(-a // b)


def _round_up(x, m):
    return ((x + m - 1) // m) * m


def _num_tensorcore_splits():
    """2 on dual-TensorCore chips (v7x), 1 on single-TC chips (v5e/v6e)."""
    try:
        dev = jax.devices()[0]
        if dev.platform != "tpu":
            return 1
        nc = getattr(dev, "num_cores", None)
        if nc is not None and int(nc) >= 2:
            return 2
        kind = str(getattr(dev, "device_kind", "")).lower()
        if "v7" in kind or "7x" in kind:
            return 2
    except Exception:
        pass
    return 1


def _make_kernel(*, rows, hdim, tile_rows, steps_per_split,
                 inv_count1, inv_count3, inv_count4):
    groups = tile_rows // SUBLANE

    def kernel(a_ref, b_ref,              # streamed: (tile_rows, hdim) blocks
               rr_ref, rp_ref, rm_ref,    # resident: recon_rating / ratings / mask
               ise_ref, re_ref,           # resident: inter_sentence_emb / recon_embedding
               ire_ref, rrt_ref,          # resident: inter_rating_emb / recon_rating
               out_ref,                   # (1, 1) SMEM per-split partial
               acc_ref):                  # (8, hdim) f32 VMEM accumulator
        c = pl.program_id(0)              # parallel split index
        i = pl.program_id(1)              # streaming step within split
        step = c * steps_per_split + i
        row_start = step * tile_rows
        valid = rows - row_start          # may be <= 0 (overflow step) or < tile_rows (tail)

        @pl.when(i == 0)
        def _init():
            acc_ref[...] = jnp.zeros_like(acc_ref)

        d = a_ref[...].astype(jnp.float32) - b_ref[...].astype(jnp.float32)

        def _accumulate(sq):
            # (tile_rows, H) -> (groups, 8, H) splits on a sublane-group boundary
            # (layout-preserving); the axis-0 sum is pure VALU vreg adds.
            acc_ref[...] += jnp.sum(sq.reshape(groups, SUBLANE, hdim), axis=0)

        @pl.when(valid >= tile_rows)
        def _full_tile():
            _accumulate(d * d)

        @pl.when(valid < tile_rows)
        def _tail_tile():
            # Boundary / overflow block: zero out rows past the true extent
            # BEFORE squaring (jnp.where also kills any garbage NaN/Inf).
            rid = lax.broadcasted_iota(jnp.int32, (tile_rows, hdim), 0)
            dm = jnp.where(rid < valid, d, 0.0)
            _accumulate(dm * dm)

        @pl.when(i == steps_per_split - 1)
        def _finalize():
            # Single cross-lane/sublane reduction per split.
            loss_1_part = jnp.sum(acc_ref[...]) * inv_count1

            # Small losses (tiny tensors, resident in VMEM); only split 0
            # contributes them to the output.
            d2 = rr_ref[...].astype(jnp.float32) - rp_ref[...].astype(jnp.float32)
            m = rm_ref[...].astype(jnp.float32)
            loss_2 = jnp.sum(d2 * d2 * m) / (jnp.sum(m) + 1e-8)

            d3 = ise_ref[...].astype(jnp.float32) - re_ref[...].astype(jnp.float32)
            loss_3 = jnp.sum(d3 * d3) * inv_count3

            d4 = ire_ref[...].astype(jnp.float32) - rrt_ref[...].astype(jnp.float32)
            loss_4 = jnp.sum(d4 * d4) * inv_count4

            gate = jnp.where(c == 0, jnp.float32(1.0), jnp.float32(0.0))
            out_ref[0, 0] = loss_1_part + gate * (loss_2 + loss_3 + loss_4)

    return kernel


def reconstruct_loss(
    recon_sentence,
    inter_sentence_emb,
    sentence_emb,
    recon_rating,
    inter_rating_emb,
    ratings_padded,
    ratings_mask,
    reconstructed_embedding,
    reconstructed_rating,
):
    """Pallas wrapper reproducing ReconstructLoss.forward (returns a scalar f32)."""
    rs = jnp.asarray(recon_sentence)
    se = jnp.asarray(sentence_emb)
    assert rs.shape == se.shape, "recon_sentence / sentence_emb must match"

    def _as2d(x):
        x = jnp.asarray(x)
        return x.reshape(1, -1) if x.ndim <= 1 else x.reshape(-1, x.shape[-1])

    # Small resident tensors: natural shapes, no padding, no copies.
    rr_s = _as2d(recon_rating)
    rp_s = _as2d(ratings_padded)
    rm_s = _as2d(ratings_mask)
    ise_s = _as2d(inter_sentence_emb)
    re_s = _as2d(reconstructed_embedding)
    ire_s = _as2d(inter_rating_emb)
    rrt_s = _as2d(reconstructed_rating)

    count1 = int(rs.size)
    count3 = int(ise_s.size)
    count4 = int(ire_s.size)

    # Large streamed pair: free reshape to (rows, H) — no pad, no HBM copy.
    big_a = _as2d(rs)
    big_b = se.reshape(big_a.shape)
    rows, hdim = big_a.shape

    # Streaming block: ~TARGET_BLOCK_BYTES per input per step, sublane-aligned.
    bytes_per_row = max(1, hdim * big_a.dtype.itemsize)
    rows_for_target = max(ROW_ALIGN, TARGET_BLOCK_BYTES // bytes_per_row)
    tile_rows = min(_round_up(rows, ROW_ALIGN), _round_up(rows_for_target, ROW_ALIGN))
    tile_rows = max(tile_rows, ROW_ALIGN)

    total_steps = _cdiv(rows, tile_rows)
    num_splits = max(1, min(_num_tensorcore_splits(), total_steps))
    steps_per_split = _cdiv(total_steps, num_splits)

    def _big_index_map(c, i):
        # Clamp overflow steps of the last split onto the last valid block;
        # their contribution is masked to zero inside the kernel.
        return (jnp.minimum(c * steps_per_split + i, total_steps - 1), 0)

    big_spec = pl.BlockSpec((tile_rows, hdim), _big_index_map)

    def _resident_spec(x):
        # Full-array block, constant index -> DMA'd once, stays in VMEM.
        return pl.BlockSpec(x.shape, lambda c, i: (0, 0))

    small_inputs = (rr_s, rp_s, rm_s, ise_s, re_s, ire_s, rrt_s)
    inputs = (big_a, big_b) + small_inputs

    # VMEM budget: 2 streamed inputs x 2 buffers x block + residents + acc + slack.
    block_bytes = tile_rows * hdim * (big_a.dtype.itemsize + big_b.dtype.itemsize)
    small_bytes = sum(int(x.size) * x.dtype.itemsize for x in small_inputs)
    vmem_needed = 2 * block_bytes + small_bytes + SUBLANE * hdim * 4 + (2 << 20)
    vmem_limit = int(min(max(vmem_needed, 32 << 20), 64 << 20))

    bytes_accessed = sum(int(a.size) * a.dtype.itemsize for a in inputs) + num_splits * 4
    flops = 3 * int(rs.size) + 5 * (small_bytes // 4 + 1)

    kernel = _make_kernel(
        rows=rows, hdim=hdim, tile_rows=tile_rows, steps_per_split=steps_per_split,
        inv_count1=1.0 / count1, inv_count3=1.0 / count3, inv_count4=1.0 / count4,
    )

    out = pl.pallas_call(
        kernel,
        out_shape=jax.ShapeDtypeStruct((num_splits, 1), jnp.float32),
        grid_spec=pltpu.PrefetchScalarGridSpec(
            num_scalar_prefetch=0,
            grid=(num_splits, steps_per_split),
            in_specs=[big_spec, big_spec] + [_resident_spec(x) for x in small_inputs],
            out_specs=pl.BlockSpec(
                (1, 1), lambda c, i: (c, 0),
                memory_space=pltpu.MemorySpace.SMEM,
            ),
            scratch_shapes=[pltpu.VMEM((SUBLANE, hdim), jnp.float32)],
        ),
        compiler_params=pltpu.CompilerParams(
            dimension_semantics=("parallel", "arbitrary"),
            vmem_limit_bytes=vmem_limit,
        ),
        cost_estimate=pl.CostEstimate(
            flops=flops, transcendentals=0, bytes_accessed=bytes_accessed
        ),
    )(*inputs)

    # loss_1 partials come from every split; loss_2/3/4 only from split 0.
    return jnp.sum(out)


def _reference_loss(rs, ise, se, rr, ire, rp, rm, re, rrt):
    loss_1 = jnp.mean((rs - se) ** 2)
    loss_2_keep = (rr - rp) ** 2
    loss_2 = jnp.sum(loss_2_keep * rm) / (jnp.sum(rm) + 1e-8)
    loss_3 = jnp.mean((ise - re) ** 2)
    loss_4 = jnp.mean((ire - rrt) ** 2)
    return loss_1 + loss_2 + loss_3 + loss_4


def _run_case(B, S, H, seed):
    key = jax.random.PRNGKey(seed)
    keys = jax.random.split(key, 9)

    recon_sentence = jax.random.normal(keys[0], (B, S, H), dtype=jnp.float32)
    sentence_emb = jax.random.normal(keys[1], (B, S, H), dtype=jnp.float32)

    recon_rating = jax.random.normal(keys[2], (B, S), dtype=jnp.float32)
    ratings_padded = jax.random.normal(keys[3], (B, S), dtype=jnp.float32)
    ratings_mask = (jax.random.uniform(keys[4], (B, S)) > 0.3).astype(jnp.float32)

    inter_sentence_emb = jax.random.normal(keys[5], (B, H), dtype=jnp.float32)
    reconstructed_embedding = jax.random.normal(keys[6], (B, H), dtype=jnp.float32)

    inter_rating_emb = jax.random.normal(keys[7], (B, H), dtype=jnp.float32)
    reconstructed_rating = jax.random.normal(keys[8], (B, H), dtype=jnp.float32)

    loss = reconstruct_loss(
        recon_sentence,
        inter_sentence_emb,
        sentence_emb,
        recon_rating,
        inter_rating_emb,
        ratings_padded,
        ratings_mask,
        reconstructed_embedding,
        reconstructed_rating,
    )
    loss = jax.block_until_ready(loss)

    ref = _reference_loss(
        recon_sentence,
        inter_sentence_emb,
        sentence_emb,
        recon_rating,
        inter_rating_emb,
        ratings_padded,
        ratings_mask,
        reconstructed_embedding,
        reconstructed_rating,
    )
    ref = jax.block_until_ready(ref)

    assert jnp.allclose(loss, ref, rtol=1e-5, atol=1e-4), (B, S, H, loss, ref)


if __name__ == "__main__":
    # Small shape from the module spec (single streaming step, full-tile path).
    _run_case(B=2, S=8, H=32, seed=0)
    # Larger shape: exercises multi-step streaming, the masked tail tile, and
    # (on dual-TC chips) the parallel-split path.
    _run_case(B=4, S=600, H=768, seed=1)
    print("KERNEL_OK")
</pallas_src>

<mosaic_0001>
module attributes {stable_mosaic.version = 11 : i64} {
  func.func @kernel(%arg0: i32, %arg1: i32, %arg2: memref<16x32xf32, #tpu.memory_space<vmem>>, %arg3: memref<16x32xf32, #tpu.memory_space<vmem>>, %arg4: memref<2x8xf32, #tpu.memory_space<vmem>>, %arg5: memref<2x8xf32, #tpu.memory_space<vmem>>, %arg6: memref<2x8xf32, #tpu.memory_space<vmem>>, %arg7: memref<2x32xf32, #tpu.memory_space<vmem>>, %arg8: memref<2x32xf32, #tpu.memory_space<vmem>>, %arg9: memref<2x32xf32, #tpu.memory_space<vmem>>, %arg10: memref<2x32xf32, #tpu.memory_space<vmem>>, %arg11: memref<1x1xf32, #tpu.memory_space<smem>>, %arg12: memref<8x32xf32, #tpu.memory_space<vmem>>) attributes {dimension_semantics = [#tpu.dimension_semantics<parallel>, #tpu.dimension_semantics<arbitrary>], iteration_bounds = array<i64: 1, 1>, scalar_prefetch = 0 : i64, scratch_operands = 1 : i64, tpu.core_type = #tpu.core_type<tc>, window_params = [{transform_indices = @transform_0, window_bounds = array<i64: 16, 32>}, {transform_indices = @transform_1, window_bounds = array<i64: 16, 32>}, {pipeline_mode = #tpu.pipeline_mode<synchronous>, transform_indices = @transform_2, window_bounds = array<i64: 2, 8>}, {pipeline_mode = #tpu.pipeline_mode<synchronous>, transform_indices = @transform_3, window_bounds = array<i64: 2, 8>}, {pipeline_mode = #tpu.pipeline_mode<synchronous>, transform_indices = @transform_4, window_bounds = array<i64: 2, 8>}, {pipeline_mode = #tpu.pipeline_mode<synchronous>, transform_indices = @transform_5, window_bounds = array<i64: 2, 32>}, {pipeline_mode = #tpu.pipeline_mode<synchronous>, transform_indices = @transform_6, window_bounds = array<i64: 2, 32>}, {pipeline_mode = #tpu.pipeline_mode<synchronous>, transform_indices = @transform_7, window_bounds = array<i64: 2, 32>}, {pipeline_mode = #tpu.pipeline_mode<synchronous>, transform_indices = @transform_8, window_bounds = array<i64: 2, 32>}, {transform_indices = @transform_9, window_bounds = array<i64: 1, 1>}]} {
    %c1_i32 = arith.constant 1 : i32
    %0 = arith.muli %arg0, %c1_i32 : i32
    %1 = arith.addi %0, %arg1 : i32
    %c16_i32 = arith.constant 16 : i32
    %2 = arith.muli %1, %c16_i32 : i32
    %c16_i32_0 = arith.constant 16 : i32
    %3 = arith.subi %c16_i32_0, %2 : i32
    %c0_i32 = arith.constant 0 : i32
    %4 = arith.cmpi eq, %arg1, %c0_i32 : i32
    %5 = arith.extui %4 : i1 to i32
    %c0_i32_1 = arith.constant 0 : i32
    %6 = arith.cmpi ne, %5, %c0_i32_1 : i32
    scf.if %6 {
      %cst = arith.constant 0.000000e+00 : f32
      %19 = vector.broadcast %cst : f32 to vector<8x32xf32>
      %c0_11 = arith.constant 0 : index
      %c0_12 = arith.constant 0 : index
      %20 = vector.load %arg12[%c0_11, %c0_12] : memref<8x32xf32, #tpu.memory_space<vmem>>, vector<8x32xf32>
      tpu.vector_store %arg12[%c0_11, %c0_12], %19 {strides = array<i32>} : memref<8x32xf32, #tpu.memory_space<vmem>>, vector<8x32xf32>,
    } else {
    }
    %c0 = arith.constant 0 : index
    %c0_2 = arith.constant 0 : index
    %7 = vector.load %arg2[%c0, %c0_2] : memref<16x32xf32, #tpu.memory_space<vmem>>, vector<16x32xf32>
    %c0_3 = arith.constant 0 : index
    %c0_4 = arith.constant 0 : index
    %8 = vector.load %arg3[%c0_3, %c0_4] : memref<16x32xf32, #tpu.memory_space<vmem>>, vector<16x32xf32>
    %9 = arith.subf %7, %8 : vector<16x32xf32>
    %c16_i32_5 = arith.constant 16 : i32
    %10 = arith.cmpi sge, %3, %c16_i32_5 : i32
    %11 = arith.extui %10 : i1 to i32
    %c0_i32_6 = arith.constant 0 : i32
    %12 = arith.cmpi ne, %11, %c0_i32_6 : i32
    scf.if %12 {
      %19 = arith.mulf %9, %9 : vector<16x32xf32>
      %c0_11 = arith.constant 0 : index
      %c0_12 = arith.constant 0 : index
      %20 = vector.load %arg12[%c0_11, %c0_12] : memref<8x32xf32, #tpu.memory_space<vmem>>, vector<8x32xf32>
      %21 = vector.shape_cast %19 : vector<16x32xf32> to vector<2x8x32xf32>
      %cst = arith.constant dense<0.000000e+00> : vector<8x32xf32>
      %22 = vector.multi_reduction <add>, %21, %cst [0] : vector<2x8x32xf32> to vector<8x32xf32>
      %23 = arith.addf %20, %22 : vector<8x32xf32>
      %c0_13 = arith.constant 0 : index
      %c0_14 = arith.constant 0 : index
      %24 = vector.load %arg12[%c0_13, %c0_14] : memref<8x32xf32, #tpu.memory_space<vmem>>, vector<8x32xf32>
      tpu.vector_store %arg12[%c0_13, %c0_14], %23 {strides = array<i32>} : memref<8x32xf32, #tpu.memory_space<vmem>>, vector<8x32xf32>,
    } else {
    }
    %c16_i32_7 = arith.constant 16 : i32
    %13 = arith.cmpi slt, %3, %c16_i32_7 : i32
    %14 = arith.extui %13 : i1 to i32
    %c0_i32_8 = arith.constant 0 : i32
    %15 = arith.cmpi ne, %14, %c0_i32_8 : i32
    scf.if %15 {
      %19 = tpu.iota {dimensions = array<i32: 0>} : vector<16x32xi32>
      %20 = vector.broadcast %3 : i32 to vector<16x32xi32>
      %21 = arith.cmpi slt, %19, %20 : vector<16x32xi32>
      %cst = arith.constant 0.000000e+00 : f32
      %22 = vector.broadcast %cst : f32 to vector<16x32xf32>
      %23 = arith.select %21, %9, %22 : vector<16x32xi1>, vector<16x32xf32>
      %24 = arith.mulf %23, %23 : vector<16x32xf32>
      %c0_11 = arith.constant 0 : index
      %c0_12 = arith.constant 0 : index
      %25 = vector.load %arg12[%c0_11, %c0_12] : memref<8x32xf32, #tpu.memory_space<vmem>>, vector<8x32xf32>
      %26 = vector.shape_cast %24 : vector<16x32xf32> to vector<2x8x32xf32>
      %cst_13 = arith.constant dense<0.000000e+00> : vector<8x32xf32>
      %27 = vector.multi_reduction <add>, %26, %cst_13 [0] : vector<2x8x32xf32> to vector<8x32xf32>
      %28 = arith.addf %25, %27 : vector<8x32xf32>
      %c0_14 = arith.constant 0 : index
      %c0_15 = arith.constant 0 : index
      %29 = vector.load %arg12[%c0_14, %c0_15] : memref<8x32xf32, #tpu.memory_space<vmem>>, vector<8x32xf32>
      tpu.vector_store %arg12[%c0_14, %c0_15], %28 {strides = array<i32>} : memref<8x32xf32, #tpu.memory_space<vmem>>, vector<8x32xf32>,
    } else {
    }
    %c0_i32_9 = arith.constant 0 : i32
    %16 = arith.cmpi eq, %arg1, %c0_i32_9 : i32
    %17 = arith.extui %16 : i1 to i32
    %c0_i32_10 = arith.constant 0 : i32
    %18 = arith.cmpi ne, %17, %c0_i32_10 : i32
    scf.if %18 {
      %c0_11 = arith.constant 0 : index
      %c0_12 = arith.constant 0 : index
      %19 = vector.load %arg12[%c0_11, %c0_12] : memref<8x32xf32, #tpu.memory_space<vmem>>, vector<8x32xf32>
      %20 = vector.shape_cast %19 : vector<8x32xf32> to vector<1x8x32xf32>
      %cst = arith.constant dense<0.000000e+00> : vector<1xf32>
      %21 = vector.multi_reduction <add>, %20, %cst [1, 2] : vector<1x8x32xf32> to vector<1xf32>
      %22 = vector.shape_cast %21 : vector<1xf32> to vector<1x1x1xf32>
      %23 = vector.extract %22[0, 0, 0] : f32 from vector<1x1x1xf32>
      %cst_13 = arith.constant 0.001953125 : f32
      %24 = arith.mulf %23, %cst_13 : f32
      %c0_14 = arith.constant 0 : index
      %c0_15 = arith.constant 0 : index
      %25 = vector.load %arg4[%c0_14, %c0_15] : memref<2x8xf32, #tpu.memory_space<vmem>>, vector<2x8xf32>
      %c0_16 = arith.constant 0 : index
      %c0_17 = arith.constant 0 : index
      %26 = vector.load %arg5[%c0_16, %c0_17] : memref<2x8xf32, #tpu.memory_space<vmem>>, vector<2x8xf32>
      %27 = arith.subf %25, %26 : vector<2x8xf32>
      %c0_18 = arith.constant 0 : index
      %c0_19 = arith.constant 0 : index
      %28 = vector.load %arg6[%c0_18, %c0_19] : memref<2x8xf32, #tpu.memory_space<vmem>>, vector<2x8xf32>
      %29 = arith.mulf %27, %27 : vector<2x8xf32>
      %30 = arith.mulf %29, %28 : vector<2x8xf32>
      %31 = vector.shape_cast %30 : vector<2x8xf32> to vector<1x2x8xf32>
      %cst_20 = arith.constant dense<0.000000e+00> : vector<1xf32>
      %32 = vector.multi_reduction <add>, %31, %cst_20 [1, 2] : vector<1x2x8xf32> to vector<1xf32>
      %33 = vector.shape_cast %32 : vector<1xf32> to vector<1x1x1xf32>
      %34 = vector.extract %33[0, 0, 0] : f32 from vector<1x1x1xf32>
      %35 = vector.shape_cast %28 : vector<2x8xf32> to vector<1x2x8xf32>
      %cst_21 = arith.constant dense<0.000000e+00> : vector<1xf32>
      %36 = vector.multi_reduction <add>, %35, %cst_21 [1, 2] : vector<1x2x8xf32> to vector<1xf32>
      %37 = vector.shape_cast %36 : vector<1xf32> to vector<1x1x1xf32>
      %38 = vector.extract %37[0, 0, 0] : f32 from vector<1x1x1xf32>
      %cst_22 = arith.constant 9.99999993E-9 : f32
      %39 = arith.addf %38, %cst_22 : f32
      %40 = arith.divf %34, %39 : f32
      %c0_23 = arith.constant 0 : index
      %c0_24 = arith.constant 0 : index
      %41 = vector.load %arg7[%c0_23, %c0_24] : memref<2x32xf32, #tpu.memory_space<vmem>>, vector<2x32xf32>
      %c0_25 = arith.constant 0 : index
      %c0_26 = arith.constant 0 : index
      %42 = vector.load %arg8[%c0_25, %c0_26] : memref<2x32xf32, #tpu.memory_space<vmem>>, vector<2x32xf32>
      %43 = arith.subf %41, %42 : vector<2x32xf32>
      %44 = arith.mulf %43, %43 : vector<2x32xf32>
      %45 = vector.shape_cast %44 : vector<2x32xf32> to vector<1x2x32xf32>
      %cst_27 = arith.constant dense<0.000000e+00> : vector<1xf32>
      %46 = vector.multi_reduction <add>, %45, %cst_27 [1, 2] : vector<1x2x32xf32> to vector<1xf32>
      %47 = vector.shape_cast %46 : vector<1xf32> to vector<1x1x1xf32>
      %48 = vector.extract %47[0, 0, 0] : f32 from vector<1x1x1xf32>
      %cst_28 = arith.constant 1.562500e-02 : f32
      %49 = arith.mulf %48, %cst_28 : f32
      %c0_29 = arith.constant 0 : index
      %c0_30 = arith.constant 0 : index
      %50 = vector.load %arg9[%c0_29, %c0_30] : memref<2x32xf32, #tpu.memory_space<vmem>>, vector<2x32xf32>
      %c0_31 = arith.constant 0 : index
      %c0_32 = arith.constant 0 : index
      %51 = vector.load %arg10[%c0_31, %c0_32] : memref<2x32xf32, #tpu.memory_space<vmem>>, vector<2x32xf32>
      %52 = arith.subf %50, %51 : vector<2x32xf32>
      %53 = arith.mulf %52, %52 : vector<2x32xf32>
      %54 = vector.shape_cast %53 : vector<2x32xf32> to vector<1x2x32xf32>
      %cst_33 = arith.constant dense<0.000000e+00> : vector<1xf32>
      %55 = vector.multi_reduction <add>, %54, %cst_33 [1, 2] : vector<1x2x32xf32> to vector<1xf32>
      %56 = vector.shape_cast %55 : vector<1xf32> to vector<1x1x1xf32>
      %57 = vector.extract %56[0, 0, 0] : f32 from vector<1x1x1xf32>
      %cst_34 = arith.constant 1.562500e-02 : f32
      %58 = arith.mulf %57, %cst_34 : f32
      %c0_i32_35 = arith.constant 0 : i32
      %59 = arith.cmpi eq, %arg0, %c0_i32_35 : i32
      %cst_36 = arith.constant 1.000000e+00 : f32
      %cst_37 = arith.constant 0.000000e+00 : f32
      %60 = arith.select %59, %cst_36, %cst_37 : f32
      %61 = arith.addf %40, %49 : f32
      %62 = arith.addf %61, %58 : f32
      %63 = arith.mulf %60, %62 : f32
      %64 = arith.addf %24, %63 : f32
      %c0_38 = arith.constant 0 : index
      %c0_39 = arith.constant 0 : index
      %65 = memref.load %arg11[%c0_38, %c0_39] : memref<1x1xf32, #tpu.memory_space<smem>>
      memref.store %64, %arg11[%c0_38, %c0_39] : memref<1x1xf32, #tpu.memory_space<smem>>
    } else {
    }
    return
  }
  func.func @transform_0(%arg0: i32, %arg1: i32) -> (i32, i32) {
    %c1_i32 = arith.constant 1 : i32
    %0 = arith.muli %arg0, %c1_i32 : i32
    %1 = arith.addi %0, %arg1 : i32
    %c0_i32 = arith.constant 0 : i32
    %2 = arith.minsi %1, %c0_i32 : i32
    %c0_i32_0 = arith.constant 0 : i32
    %c0_i32_1 = arith.constant 0 : i32
    return %2, %c0_i32_0 : i32, i32
  }
  func.func @transform_1(%arg0: i32, %arg1: i32) -> (i32, i32) {
    %c1_i32 = arith.constant 1 : i32
    %0 = arith.muli %arg0, %c1_i32 : i32
    %1 = arith.addi %0, %arg1 : i32
    %c0_i32 = arith.constant 0 : i32
    %2 = arith.minsi %1, %c0_i32 : i32
    %c0_i32_0 = arith.constant 0 : i32
    %c0_i32_1 = arith.constant 0 : i32
    return %2, %c0_i32_0 : i32, i32
  }
  func.func @transform_2(%arg0: i32, %arg1: i32) -> (i32, i32) {
    %c0_i32 = arith.constant 0 : i32
    %c0_i32_0 = arith.constant 0 : i32
    %c0_i32_1 = arith.constant 0 : i32
    return %c0_i32, %c0_i32_0 : i32, i32
  }
  func.func @transform_3(%arg0: i32, %arg1: i32) -> (i32, i32) {
    %c0_i32 = arith.constant 0 : i32
    %c0_i32_0 = arith.constant 0 : i32
    %c0_i32_1 = arith.constant 0 : i32
    return %c0_i32, %c0_i32_0 : i32, i32
  }
  func.func @transform_4(%arg0: i32, %arg1: i32) -> (i32, i32) {
    %c0_i32 = arith.constant 0 : i32
    %c0_i32_0 = arith.constant 0 : i32
    %c0_i32_1 = arith.constant 0 : i32
    return %c0_i32, %c0_i32_0 : i32, i32
  }
  func.func @transform_5(%arg0: i32, %arg1: i32) -> (i32, i32) {
    %c0_i32 = arith.constant 0 : i32
    %c0_i32_0 = arith.constant 0 : i32
    %c0_i32_1 = arith.constant 0 : i32
    return %c0_i32, %c0_i32_0 : i32, i32
  }
  func.func @transform_6(%arg0: i32, %arg1: i32) -> (i32, i32) {
    %c0_i32 = arith.constant 0 : i32
    %c0_i32_0 = arith.constant 0 : i32
    %c0_i32_1 = arith.constant 0 : i32
    return %c0_i32, %c0_i32_0 : i32, i32
  }
  func.func @transform_7(%arg0: i32, %arg1: i32) -> (i32, i32) {
    %c0_i32 = arith.constant 0 : i32
    %c0_i32_0 = arith.constant 0 : i32
    %c0_i32_1 = arith.constant 0 : i32
    return %c0_i32, %c0_i32_0 : i32, i32
  }
  func.func @transform_8(%arg0: i32, %arg1: i32) -> (i32, i32) {
    %c0_i32 = arith.constant 0 : i32
    %c0_i32_0 = arith.constant 0 : i32
    %c0_i32_1 = arith.constant 0 : i32
    return %c0_i32, %c0_i32_0 : i32, i32
  }
  func.func @transform_9(%arg0: i32, %arg1: i32) -> (i32, i32) {
    %c0_i32 = arith.constant 0 : i32
    %c0_i32_0 = arith.constant 0 : i32
    return %arg0, %c0_i32 : i32, i32
  }
}

</mosaic_0001>

<bundles_post_ra>
// kernel: tpu_custom_call.1
= control target key start
LH: loop header
LB: loop body
LE: loop exit
PB: predicated region body
PF: predicated region fallthrough
CT: control target
= control target key end

     0   :  { %14 = vsyncpa [#allocation4], 0  ;;  %s408_s0 = inlined_call_operand.hbm [shape: f32[16,32], index: 0, kind: input, shape index: {}]   ;;  %s409_s1 = inlined_call_operand.hbm [shape: f32[16,32], index: 1, kind: input, shape index: {}]   ;;  %s410_s2 = inlined_call_operand.vmem [shape: f32[2,8], index: 2, kind: input, shape index: {}]   ;;  %s411_s3 = inlined_call_operand.vmem [shape: f32[2,8], index: 3, kind: input, shape index: {}]   ;;  %s412_s4 = inlined_call_operand.vmem [shape: f32[2,8], index: 4, kind: input, shape index: {}]   ;;  %s413_s5 = inlined_call_operand.vmem [shape: f32[2,32], index: 5, kind: input, shape index: {}]   ;;  %s414_s6 = inlined_call_operand.vmem [shape: f32[2,32], index: 6, kind: input, shape index: {}]   ;;  %s415_s7 = inlined_call_operand.vmem [shape: f32[2,32], index: 7, kind: input, shape index: {}]   ;;  %s416_s8 = inlined_call_operand.vmem [shape: f32[2,32], index: 8, kind: input, shape index: {}]   ;;  %s417_s9 = inlined_call_operand.hbm [shape: f32[1,1], index: 9, kind: output, shape index: {}]  }
   0x1   :  { %15 = vsyncpa [#allocation7], 0 }
   0x2   :  { %16 = vsyncpa [#allocation5], 0  ;;  %s310_s30 = smov [#allocation3]  }
   0x3   :  { %s28_s10 = sshll.u32 %s310_s30, 4  ;;  %s29_s10 = int_to_ptr.vmem [resolvable:$true] %s28_s10 }
   0x4   :  { %s264_s11 = scalar_lea.vmem %s29_s10, 256  ;;  %p269_p1 = scmp.lt.s32.totalorder %s29_s10, %s29_s10 }
   0x5   :  { %p265_p0 = scmp.ne.s32.totalorder %s29_s10, %s264_s11  ;;  %p270_p2 = scmp.lt.s32.totalorder %s264_s11, %s264_s11 }
   0x7   :  { %p271_p3 = por %p270_p2, %p269_p1 }
   0x9   :  { %p272_p4 = pnand %p271_p3, %p265_p0 }
   0xb   :  { %275 = shalt.err (!%p272_p4)
}
   0xc   :  { %s311_s12 = smov 128   ;;  %s312_s13 = smov 8  }
   0xd   :  { %34 = dma.hbm_to_vmem [thread:$0]  %s408_s0, 256, %s29_s10, [#allocation4], %s311_s12, %s311_s12, %s312_s13  }
   0xe   :  { %s313_s16 = smov [#allocation6]  }
   0xf   :  { %s46_s17 = sshll.u32 %s313_s16, 4  ;;  %s47_s17 = int_to_ptr.vmem [resolvable:$true] %s46_s17 }
  0x10   :  { %s284_s18 = scalar_lea.vmem %s47_s17, 256  ;;  %p289_p6 = scmp.lt.s32.totalorder %s47_s17, %s47_s17 }
  0x11   :  { %p285_p5 = scmp.ne.s32.totalorder %s47_s17, %s284_s18  ;;  %p290_p7 = scmp.lt.s32.totalorder %s284_s18, %s284_s18 }
  0x13   :  { %p291_p8 = por %p290_p7, %p289_p6 }
  0x15   :  { %p292_p9 = pnand %p291_p8, %p285_p5 }
  0x17   :  { %295 = shalt.err (!%p292_p9)
}
  0x18   :  { %52 = dma.hbm_to_vmem [thread:$0]  %s409_s1, 256, %s47_s17, [#allocation7], %s311_s12, %s311_s12, %s312_s13  }
  0x19   :  { %304 = dma.done.wait [#allocation4], 256  }
  0x1a   :  { %305 = vsyncadd [#allocation4], 4294967040 }
  0x1b   :  { %306 = dma.done.wait [#allocation7], 256  }
  0x1c   :  { %307 = vsyncadd [#allocation7], 4294967040  ;;  %vm88_vm0 = vcmask 261120   ;;  %v314_v0 = vmov 0.0   ;;  %vm152_vm1 = vcmask 58368   ;;  %v90_v3 = vld [vmem:[#allocation3] sm:$0xff] }
  0x1d   :  { %89 = vst.msk [vmem:[#allocation2] sm:$0xff] %vm88_vm0, %v314_v0  ;;  %v149_v1 = vld [vmem:[%s412_s4] sm:$0x3]  ;;  %v91_v4 = vld [vmem:[#allocation3 + $0x8] sm:$0xff]  ;;  %v92_v5 = vld [vmem:[#allocation6] sm:$0xff]  ;;  %vm182_vm2 = vcmask 254976  }
  0x1e   :  { %v163_v2 = vsel %vm152_vm1, %v149_v1, 0.0  ;;  %v93_v6 = vld [vmem:[#allocation6 + $0x8] sm:$0xff]  ;;  %v94_v7 = vsub.f32 %v90_v3, %v92_v5  ;;  %s315_s19 = smov [#allocation8]  }
  0x1f   :  { %164 = vadd.xlane.f32.xlu1 %v163_v2  ;;  %v178_v8 = vld [vmem:[%s413_s5] sm:$0x3]  ;;  %v95_v9 = vsub.f32 %v91_v4, %v93_v6 }
  0x20   :  { %v179_v10 = vld [vmem:[%s414_s6] sm:$0x3]  ;;  %v100_v11 = vmul.f32 %v94_v7, %v94_v7 }
  0x21   :  { %v180_v12 = vsub.f32 %v178_v8, %v179_v10  ;;  %v101_v13 = vmul.f32 %v95_v9, %v95_v9  ;;  %v146_v16 = vld [vmem:[%s410_s2] sm:$0x3] }
  0x22   :  { %v104_v14 = vsel %vm88_vm0, %v100_v11, 0.0  ;;  %v147_v17 = vld [vmem:[%s411_s3] sm:$0x3] }
  0x23   :  { %v181_v15 = vmul.f32 %v180_v12, %v180_v12  ;;  %v105_v19 = vsel %vm88_vm0, %v101_v13, 0.0  ;;  %v148_v22 = vsub.f32 %v146_v16, %v147_v17  ;;  %v194_v25 = vld [vmem:[%s415_s7] sm:$0x3] }
  0x24   :  { %v102_v18 = vld [vmem:[#allocation2] sm:$0xff]  ;;  %v106_v20 = vadd.f32 %v105_v19, %v104_v14 }
  0x25   :  { %v183_v21 = vsel %vm182_vm2, %v181_v15, 0.0  ;;  %v150_v24 = vmul.f32 %v148_v22, %v148_v22  ;;  %v195_v26 = vld [vmem:[%s416_s8] sm:$0x3] }
  0x26   :  { %184 = vadd.xlane.f32.xlu1 %v183_v21  ;;  %v107_v23 = vadd.f32 %v106_v20, %v102_v18  ;;  %v196_v28 = vsub.f32 %v194_v25, %v195_v26 }
  0x27   :  { %v151_v27 = vmul.f32 %v150_v24, %v149_v1 }
  0x28   :  { %108 = vst.msk [vmem:[#allocation2] sm:$0xff] %vm88_vm0, %v107_v23  ;;  %v197_v32 = vmul.f32 %v196_v28, %v196_v28 }
  0x29   :  { %v153_v31 = vsel %vm152_vm1, %v151_v27, 0.0 }
  0x2a   :  { %v198_v33 = vsel %vm182_vm2, %v197_v32, 0.0 }
  0x2f   :  { %v133_v29 = vld [vmem:[#allocation2] sm:$0xff] }
  0x30   :  { %v135_v30 = vsel %vm88_vm0, %v133_v29, 0.0 }
  0x31   :  { %136 = vadd.xlane.f32.xlu0 %v135_v30 }
  0x35   :  { %154 = vadd.xlane.f32.xlu0 %v153_v31 }
  0x39   :  { %199 = vadd.xlane.f32.xlu0 %v198_v33 }
  0xa8   :  { %v165_v34 = vpop.xlane.xlu1 %164 }
  0xa9   :  { %v166_v35 = vrot.slane %v165_v34, 4 }
  0xab   :  { %v167_v36 = vadd.f32 %v166_v35, %v165_v34 }
  0xad   :  { %v168_v40 = vrot.slane %v167_v36, 2 }
  0xaf   :  { %v169_v46 = vadd.f32 %v168_v40, %v167_v36  ;;  %v185_v55 = vpop.xlane.xlu1 %184 }
  0xb0   :  { %v186_v57 = vrot.slane %v185_v55, 4 }
  0xb1   :  { %v170_v51 = vrot.slane %v169_v46, 1 }
  0xb2   :  { %v187_v59 = vadd.f32 %v186_v57, %v185_v55 }
  0xb3   :  { %v171_v54 = vadd.f32 %v170_v51, %v169_v46 }
  0xb4   :  { %v188_v62 = vrot.slane %v187_v59, 2 }
  0xb6   :  { %v189_v0 = vadd.f32 %v188_v62, %v187_v59 }
  0xb8   :  { %v190_v2 = vrot.slane %v189_v0, 1 }
  0xba   :  { %v137_v37 = vpop.xlane.xlu0 %136  ;;  %v191_v5 = vadd.f32 %v190_v2, %v189_v0 }
  0xbb   :  { %v138_v38 = vrot.slane %v137_v37, 4 }
  0xbd   :  { %v139_v39 = vadd.f32 %v138_v38, %v137_v37 }
  0xbe   :  { %v155_v41 = vpop.xlane.xlu0 %154 }
  0xbf   :  { %v140_v42 = vrot.slane %v139_v39, 2  ;;  %v156_v43 = vrot.slane %v155_v41, 4 }
  0xc1   :  { %v157_v44 = vadd.f32 %v156_v43, %v155_v41  ;;  %v141_v45 = vadd.f32 %v140_v42, %v139_v39 }
  0xc2   :  { %v200_v56 = vpop.xlane.xlu0 %199 }
  0xc3   :  { %v158_v47 = vrot.slane %v157_v44, 2  ;;  %v142_v48 = vrot.slane %v141_v45, 1  ;;  %v201_v58 = vrot.slane %v200_v56, 4 }
  0xc5   :  { %v143_v49 = vadd.f32 %v142_v48, %v141_v45  ;;  %v159_v50 = vadd.f32 %v158_v47, %v157_v44  ;;  %v202_v60 = vadd.f32 %v201_v58, %v200_v56 }
  0xc7   :  { %236 = vpush %v143_v49  ;;  %v160_v52 = vrot.slane %v159_v50, 1  ;;  %v203_v63 = vrot.slane %v202_v60, 2 }
  0xc9   :  { %v161_v53 = vadd.f32 %v160_v52, %v159_v50  ;;  %v204_v1 = vadd.f32 %v203_v63, %v202_v60 }
  0xcb   :  { %238 = vpush %v161_v53  ;;  %v205_v3 = vrot.slane %v204_v1, 1 }
  0xcc   :  { %240 = vpush %v171_v54 }
  0xcd   :  { %v206_v6 = vadd.f32 %v205_v3, %v204_v1 }
  0xf8   :  { %s402_s3 = spop %236 }
  0xf9   :  { %s145_s16 = smul.f32 0.001953125, %s402_s3 }
  0xfc   :  { %s239_s7 = spop %238 }
  0xfd   :  { %s241_s8 = spop %240 }
  0xfe   :  { %s173_s29 = sadd.f32 1e-08, %s241_s8 }
 0x100   :  { %v174_v61 = vstv %s173_s29 }
 0x101   :  { %254 = vrcp.f32 %v174_v61 }
 0x10e   :  { %v255_v4 = vpop.eup %254 }
 0x10f   :  { %242 = vpush %v255_v4 }
 0x110   :  { %244 = vpush %v191_v5 }
 0x111   :  { %246 = vpush %v206_v6 }
 0x140   :  { %s243_s30 = spop %242 }
 0x141   :  { %s177_s10 = smul.f32 %s243_s30, %s239_s7  ;;  %s245_s11 = spop %244 }
 0x142   :  { %s193_s12 = smul.f32 0.015625, %s245_s11  ;;  %s247_s13 = spop %246 }
 0x143   :  { %s208_s15 = smul.f32 0.015625, %s247_s13 }
 0x144   :  { %s211_s14 = sadd.f32 %s193_s12, %s177_s10 }
 0x146   :  { %s212_s17 = sadd.f32 %s211_s14, %s208_s15 }
 0x148   :  { %s214_s18 = sadd.f32 %s212_s17, %s145_s16 }
 0x14a   :  { %216 = sst [smem:[#allocation8]] %s214_s18 }
 0x14b   :  { %224 = dma.smem_to_hbm %s315_s19, 16, %s417_s9, [#allocation5]  }
 0x14c   :  { %308 = dma.done.wait [#allocation5], 16  }
 0x14d   :  { %309 = vsyncadd [#allocation5], 4294967280 }
 0x14e   :  { %228 = sfence }
 0x14f   :  { %229 = vsyncpa [#allocation4], 1 }
 0x150   :  { %230 = vsyncpa [#allocation7], 1 }
 0x151   :  { %231 = vsyncpa [#allocation5], 1 }

</bundles_post_ra>
